<compile_context>
chip_gen: v6e
topology: v6e:2x2x1
jax: 0.10.0
libtpu: 0.0.40
codegen_flags: <defaults>
</compile_context>

<pallas_src>
import jax
import jax.numpy as jnp
from jax.experimental import pallas as pl
from jax.experimental.pallas import tpu as pltpu


_TILE_TARGET_BYTES = 8 << 20   # per-step slab target; safe on v5e/v6e/v7x
_VMEM_SLACK_BYTES = 2 << 20


def _round_up(x, m):
    return ((x + m - 1) // m) * m


# --------------------------------------------------------------------------
# Kernels
# --------------------------------------------------------------------------
def _ca_fused_kernel(x_ref, w1t_ref, b1_ref, w2t_ref, b2_ref, o_ref):
    """Single-pass: pool + MLP + scale on a (Nb, C, HWp) slab."""
    x = x_ref[...]                                                 # (Nb, C, HWp)
    # Spatial sum in f32 (1/HW is folded into w1t; zero-pad lanes contribute 0).
    pooled = jnp.sum(x, axis=-1, dtype=jnp.float32)                # (Nb, C)
    h = jnp.maximum(
        jnp.dot(pooled, w1t_ref[...], preferred_element_type=jnp.float32)
        + b1_ref[...], 0.0)                                        # (Nb, Cr)
    z = (jnp.dot(h, w2t_ref[...], preferred_element_type=jnp.float32)
         + b2_ref[...])                                            # (Nb, C); avg+max fold in w2t/b2
    y = jax.nn.sigmoid(z).astype(x.dtype)                          # (Nb, C)
    o_ref[...] = x * y[:, :, None]


def _ca_pool_mlp_kernel(x_ref, w1t_ref, b1_ref, w2t_ref, b2_ref, y_ref):
    """Fallback pass 1: accumulate spatial sum over HW tiles, finalize with MLP."""
    h = pl.program_id(1)

    @pl.when(h == 0)
    def _():
        y_ref[...] = jnp.zeros_like(y_ref)

    y_ref[...] += jnp.sum(x_ref[...], axis=-1, dtype=jnp.float32)[:, None, :]

    @pl.when(h == pl.num_programs(1) - 1)
    def _():
        pooled = y_ref[...][:, 0, :]                               # (1, C) spatial sum
        hid = jnp.maximum(
            jnp.dot(pooled, w1t_ref[...], preferred_element_type=jnp.float32)
            + b1_ref[...], 0.0)
        z = (jnp.dot(hid, w2t_ref[...], preferred_element_type=jnp.float32)
             + b2_ref[...])
        y_ref[...] = jax.nn.sigmoid(z)[:, None, :]                 # store channel gates


def _ca_scale_kernel(y_ref, x_ref, o_ref):
    """Fallback pass 2: elementwise x * gate, HW tiled."""
    x = x_ref[...]                                                 # (1, C, thw)
    y = y_ref[...][:, 0, :].astype(x.dtype)                        # (1, C)
    o_ref[...] = x * y[:, :, None]


# --------------------------------------------------------------------------
# Tiling helpers
# --------------------------------------------------------------------------
def _choose_batch_block(n, per_image_bytes, target_bytes):
    """Largest Nb whose slab <= target, keeping >=2 steps per TensorCore
    (>=4 total) when N allows, >=2 otherwise."""
    nb = max(1, min(n, target_bytes // max(per_image_bytes, 1)))
    if n >= 4:
        nb = min(nb, pl.cdiv(n, 4))
    elif n >= 2:
        nb = min(nb, pl.cdiv(n, 2))
    return max(1, nb)


def _vmem_limit(tile_bytes, weight_bytes):
    needed = 4 * tile_bytes + 2 * weight_bytes + _VMEM_SLACK_BYTES
    return max(needed, 32 << 20)


# --------------------------------------------------------------------------
# Paths
# --------------------------------------------------------------------------
def _ca_single_pass(x_flat, w1t, b1r, w2t, b2r, tile_target_bytes, weight_bytes):
    N, C, HWp = x_flat.shape
    Cr = w1t.shape[1]
    itemsize = jnp.dtype(x_flat.dtype).itemsize
    per_image_bytes = C * HWp * itemsize

    Nb = _choose_batch_block(N, per_image_bytes, tile_target_bytes)
    grid = (pl.cdiv(N, Nb),)            # ragged tail OK: OOB writes dropped,
                                        # garbage rows never cross rows.
    tile_bytes = Nb * per_image_bytes

    cost = pl.CostEstimate(
        flops=3 * N * C * HWp + 4 * N * C * Cr,
        transcendentals=N * C,
        bytes_accessed=2 * N * C * HWp * itemsize + weight_bytes,
    )

    # TODO(synk): expose input_output_aliases={0: 0} when callers can donate x.
    return pl.pallas_call(
        _ca_fused_kernel,
        out_shape=jax.ShapeDtypeStruct((N, C, HWp), x_flat.dtype),
        grid_spec=pltpu.PrefetchScalarGridSpec(
            num_scalar_prefetch=0,
            grid=grid,
            in_specs=[
                pl.BlockSpec((Nb, C, HWp), lambda n: (n, 0, 0)),
                pl.BlockSpec((C, Cr), lambda n: (0, 0)),
                pl.BlockSpec((1, Cr), lambda n: (0, 0)),
                pl.BlockSpec((Cr, C), lambda n: (0, 0)),
                pl.BlockSpec((1, C), lambda n: (0, 0)),
            ],
            out_specs=pl.BlockSpec((Nb, C, HWp), lambda n: (n, 0, 0)),
        ),
        compiler_params=pltpu.CompilerParams(
            dimension_semantics=("parallel",),
            vmem_limit_bytes=_vmem_limit(tile_bytes, weight_bytes),
        ),
        cost_estimate=cost,
    )(x_flat, w1t, b1r, w2t, b2r)


def _ca_two_pass(x_flat, w1t, b1r, w2t, b2r, tile_target_bytes, weight_bytes):
    N, C, HWp = x_flat.shape
    Cr = w1t.shape[1]
    itemsize = jnp.dtype(x_flat.dtype).itemsize

    # Spatial tile: largest multiple of 128 that divides HWp and fits budget
    # (divides exactly -> no garbage lanes enter the pooled sum).
    n_units = HWp // 128
    max_units = max(1, tile_target_bytes // (C * itemsize * 128))
    units = 1
    for d in range(1, n_units + 1):
        if n_units % d == 0 and d <= max_units:
            units = d
    thw = units * 128
    n_hw = HWp // thw
    tile_bytes = C * thw * itemsize
    vmem_limit = _vmem_limit(tile_bytes, weight_bytes)

    # Pass 1: HW-tiled spatial-sum accumulation + MLP finalize -> (N, 1, C) gates.
    y = pl.pallas_call(
        _ca_pool_mlp_kernel,
        out_shape=jax.ShapeDtypeStruct((N, 1, C), jnp.float32),
        grid_spec=pltpu.PrefetchScalarGridSpec(
            num_scalar_prefetch=0,
            grid=(N, n_hw),
            in_specs=[
                pl.BlockSpec((1, C, thw), lambda n, h: (n, 0, h)),
                pl.BlockSpec((C, Cr), lambda n, h: (0, 0)),
                pl.BlockSpec((1, Cr), lambda n, h: (0, 0)),
                pl.BlockSpec((Cr, C), lambda n, h: (0, 0)),
                pl.BlockSpec((1, C), lambda n, h: (0, 0)),
            ],
            out_specs=pl.BlockSpec((1, 1, C), lambda n, h: (n, 0, 0)),
        ),
        compiler_params=pltpu.CompilerParams(
            dimension_semantics=("parallel", "arbitrary"),
            vmem_limit_bytes=vmem_limit,
        ),
        cost_estimate=pl.CostEstimate(
            flops=2 * N * C * HWp + 4 * N * C * Cr,
            transcendentals=N * C,
            bytes_accessed=N * C * HWp * itemsize + weight_bytes,
        ),
    )(x_flat, w1t, b1r, w2t, b2r)

    # Pass 2: elementwise scale, HW on its own parallel grid axis.
    return pl.pallas_call(
        _ca_scale_kernel,
        out_shape=jax.ShapeDtypeStruct((N, C, HWp), x_flat.dtype),
        grid_spec=pltpu.PrefetchScalarGridSpec(
            num_scalar_prefetch=0,
            grid=(N, n_hw),
            in_specs=[
                pl.BlockSpec((1, 1, C), lambda n, h: (n, 0, 0)),
                pl.BlockSpec((1, C, thw), lambda n, h: (n, 0, h)),
            ],
            out_specs=pl.BlockSpec((1, C, thw), lambda n, h: (n, 0, h)),
        ),
        compiler_params=pltpu.CompilerParams(
            dimension_semantics=("parallel", "parallel"),
            vmem_limit_bytes=vmem_limit,
        ),
        cost_estimate=pl.CostEstimate(
            flops=N * C * HWp,
            transcendentals=0,
            bytes_accessed=2 * N * C * HWp * itemsize,
        ),
    )(y, x_flat)


# --------------------------------------------------------------------------
# Public wrapper
# --------------------------------------------------------------------------
def ca_layer(x, w1, b1, w2, b2, *, tile_target_bytes=_TILE_TARGET_BYTES):
    """CALayer forward. x: (N, C, H, W); w1: (Cr, C); b1: (Cr,); w2: (C, Cr); b2: (C,)."""
    N, C, H, W = x.shape
    Cr = w1.shape[0]
    HW = H * W
    itemsize = jnp.dtype(x.dtype).itemsize

    # Fold 1/HW into the first conv (pool becomes a pure sum) and the
    # avg_y + max_y sum (both branches identical) into the second conv.
    w1t = (w1.astype(jnp.float32) / float(HW)).T            # (C, Cr)
    b1r = b1.reshape(1, Cr).astype(jnp.float32)
    w2t = (2.0 * w2.astype(jnp.float32)).T                  # (Cr, C)
    b2r = (2.0 * b2).reshape(1, C).astype(jnp.float32)
    weight_bytes = (C * Cr * 2 + Cr + C) * 4

    # Lane-dense stores: pad flattened spatial axis to a multiple of 128 with
    # zeros (zeros don't perturb the pooled sum; pad is sliced off afterwards).
    HWp = _round_up(HW, 128)
    x_flat = x.reshape(N, C, HW)
    if HWp != HW:
        x_flat = jnp.pad(x_flat, ((0, 0), (0, 0), (0, HWp - HW)))

    per_image_bytes = C * HWp * itemsize
    if per_image_bytes <= tile_target_bytes:
        out = _ca_single_pass(x_flat, w1t, b1r, w2t, b2r,
                              tile_target_bytes, weight_bytes)
    else:
        out = _ca_two_pass(x_flat, w1t, b1r, w2t, b2r,
                           tile_target_bytes, weight_bytes)

    if HWp != HW:
        out = out[:, :, :HW]
    return out.reshape(N, C, H, W)


# --------------------------------------------------------------------------
# Pure-JAX reference (mirrors the PyTorch forward exactly)
# --------------------------------------------------------------------------
def _reference(x, w1, b1, w2, b2):
    pooled = jnp.mean(x, axis=(2, 3))                        # both pools are avg pools

    def conv_du(p):
        h = jnp.maximum(p @ w1.T + b1, 0.0)
        return h @ w2.T + b2

    y = jax.nn.sigmoid(conv_du(pooled) + conv_du(pooled))
    return x * y[:, :, None, None]


if __name__ == "__main__":
    key = jax.random.PRNGKey(0)
    N, C, H, W = 2, 32, 16, 16
    reduction = 16
    Cr = C // reduction

    kx, kw1, kb1, kw2, kb2 = jax.random.split(key, 5)
    x = jax.random.normal(kx, (N, C, H, W), dtype=jnp.float32)
    # Conv2d(C, Cr, 1) weight (Cr, C, 1, 1) squeezed -> (Cr, C); Conv2d(Cr, C, 1) -> (C, Cr)
    w1 = jax.random.normal(kw1, (Cr, C), dtype=jnp.float32) * 0.1
    b1 = jax.random.normal(kb1, (Cr,), dtype=jnp.float32) * 0.1
    w2 = jax.random.normal(kw2, (C, Cr), dtype=jnp.float32) * 0.1
    b2 = jax.random.normal(kb2, (C,), dtype=jnp.float32) * 0.1

    ref = _reference(x, w1, b1, w2, b2)

    # Single-pass (default) path.
    out = ca_layer(x, w1, b1, w2, b2)
    jax.block_until_ready(out)
    assert out.shape == (N, C, H, W)
    assert jnp.allclose(out, ref, atol=1e-5, rtol=1e-5), "single-pass mismatch"

    # Force the large-image two-pass fallback (tiny slab budget) and verify it too.
    out2 = ca_layer(x, w1, b1, w2, b2, tile_target_bytes=16 << 10)
    jax.block_until_ready(out2)
    assert jnp.allclose(out2, ref, atol=1e-5, rtol=1e-5), "two-pass mismatch"

    print("KERNEL_OK")
</pallas_src>

<mosaic_0001>
module attributes {stable_mosaic.version = 11 : i64} {
  func.func @_ca_fused_kernel(%arg0: i32, %arg1: memref<1x32x256xf32, #tpu.memory_space<vmem>>, %arg2: memref<32x2xf32, #tpu.memory_space<vmem>>, %arg3: memref<1x2xf32, #tpu.memory_space<vmem>>, %arg4: memref<2x32xf32, #tpu.memory_space<vmem>>, %arg5: memref<1x32xf32, #tpu.memory_space<vmem>>, %arg6: memref<1x32x256xf32, #tpu.memory_space<vmem>>) attributes {dimension_semantics = [#tpu.dimension_semantics<parallel>], iteration_bounds = array<i64: 2>, scalar_prefetch = 0 : i64, scratch_operands = 0 : i64, tpu.core_type = #tpu.core_type<tc>, window_params = [{transform_indices = @transform_0, window_bounds = array<i64: 1, 32, 256>}, {pipeline_mode = #tpu.pipeline_mode<synchronous>, transform_indices = @transform_1, window_bounds = array<i64: 32, 2>}, {pipeline_mode = #tpu.pipeline_mode<synchronous>, transform_indices = @transform_2, window_bounds = array<i64: 1, 2>}, {pipeline_mode = #tpu.pipeline_mode<synchronous>, transform_indices = @transform_3, window_bounds = array<i64: 2, 32>}, {pipeline_mode = #tpu.pipeline_mode<synchronous>, transform_indices = @transform_4, window_bounds = array<i64: 1, 32>}, {transform_indices = @transform_5, window_bounds = array<i64: 1, 32, 256>}]} {
    %c0 = arith.constant 0 : index
    %c0_0 = arith.constant 0 : index
    %c0_1 = arith.constant 0 : index
    %0 = vector.load %arg1[%c0, %c0_0, %c0_1] : memref<1x32x256xf32, #tpu.memory_space<vmem>>, vector<1x32x256xf32>
    %cst = arith.constant dense<0.000000e+00> : vector<1x32xf32>
    %1 = vector.multi_reduction <add>, %0, %cst [2] : vector<1x32x256xf32> to vector<1x32xf32>
    %c0_2 = arith.constant 0 : index
    %c0_3 = arith.constant 0 : index
    %2 = vector.load %arg2[%c0_2, %c0_3] : memref<32x2xf32, #tpu.memory_space<vmem>>, vector<32x2xf32>
    %cst_4 = arith.constant dense<0.000000e+00> : vector<1x2xf32>
    %3 = tpu.matmul %1, %2, %cst_4 {dimension_numbers = #tpu.dot_dimension_numbers<[1], [0], [0], [1], [0, 0, 1, 1], [], []>} : vector<1x32xf32>, vector<32x2xf32>, vector<1x2xf32> -> vector<1x2xf32>
    %c0_5 = arith.constant 0 : index
    %c0_6 = arith.constant 0 : index
    %4 = vector.load %arg3[%c0_5, %c0_6] : memref<1x2xf32, #tpu.memory_space<vmem>>, vector<1x2xf32>
    %5 = arith.addf %3, %4 : vector<1x2xf32>
    %cst_7 = arith.constant 0.000000e+00 : f32
    %6 = vector.broadcast %cst_7 : f32 to vector<1x2xf32>
    %7 = arith.maximumf %5, %6 : vector<1x2xf32>
    %c0_8 = arith.constant 0 : index
    %c0_9 = arith.constant 0 : index
    %8 = vector.load %arg4[%c0_8, %c0_9] : memref<2x32xf32, #tpu.memory_space<vmem>>, vector<2x32xf32>
    %cst_10 = arith.constant dense<0.000000e+00> : vector<1x32xf32>
    %9 = tpu.matmul %7, %8, %cst_10 {dimension_numbers = #tpu.dot_dimension_numbers<[1], [0], [0], [1], [0, 0, 1, 1], [], []>} : vector<1x2xf32>, vector<2x32xf32>, vector<1x32xf32> -> vector<1x32xf32>
    %c0_11 = arith.constant 0 : index
    %c0_12 = arith.constant 0 : index
    %10 = vector.load %arg5[%c0_11, %c0_12] : memref<1x32xf32, #tpu.memory_space<vmem>>, vector<1x32xf32>
    %11 = arith.addf %9, %10 : vector<1x32xf32>
    %12 = arith.negf %11 : vector<1x32xf32>
    %13 = math.exp %12 : vector<1x32xf32>
    %cst_13 = arith.constant 1.000000e+00 : f32
    %14 = vector.broadcast %cst_13 : f32 to vector<1x32xf32>
    %15 = arith.addf %14, %13 : vector<1x32xf32>
    %16 = arith.divf %14, %15 : vector<1x32xf32>
    %17 = vector.shape_cast %16 : vector<1x32xf32> to vector<1x32x1xf32>
    %18 = vector.broadcast %17 : vector<1x32x1xf32> to vector<1x32x256xf32>
    %19 = arith.mulf %0, %18 : vector<1x32x256xf32>
    %c0_14 = arith.constant 0 : index
    %c0_15 = arith.constant 0 : index
    %c0_16 = arith.constant 0 : index
    %20 = vector.load %arg6[%c0_14, %c0_15, %c0_16] : memref<1x32x256xf32, #tpu.memory_space<vmem>>, vector<1x32x256xf32>
    tpu.vector_store %arg6[%c0_14, %c0_15, %c0_16], %19 {strides = array<i32>} : memref<1x32x256xf32, #tpu.memory_space<vmem>>, vector<1x32x256xf32>,
    return
  }
  func.func @transform_0(%arg0: i32) -> (i32, i32, i32) {
    %c0_i32 = arith.constant 0 : i32
    %c0_i32_0 = arith.constant 0 : i32
    %c0_i32_1 = arith.constant 0 : i32
    return %arg0, %c0_i32, %c0_i32_0 : i32, i32, i32
  }
  func.func @transform_1(%arg0: i32) -> (i32, i32) {
    %c0_i32 = arith.constant 0 : i32
    %c0_i32_0 = arith.constant 0 : i32
    %c0_i32_1 = arith.constant 0 : i32
    return %c0_i32, %c0_i32_0 : i32, i32
  }
  func.func @transform_2(%arg0: i32) -> (i32, i32) {
    %c0_i32 = arith.constant 0 : i32
    %c0_i32_0 = arith.constant 0 : i32
    %c0_i32_1 = arith.constant 0 : i32
    return %c0_i32, %c0_i32_0 : i32, i32
  }
  func.func @transform_3(%arg0: i32) -> (i32, i32) {
    %c0_i32 = arith.constant 0 : i32
    %c0_i32_0 = arith.constant 0 : i32
    %c0_i32_1 = arith.constant 0 : i32
    return %c0_i32, %c0_i32_0 : i32, i32
  }
  func.func @transform_4(%arg0: i32) -> (i32, i32) {
    %c0_i32 = arith.constant 0 : i32
    %c0_i32_0 = arith.constant 0 : i32
    %c0_i32_1 = arith.constant 0 : i32
    return %c0_i32, %c0_i32_0 : i32, i32
  }
  func.func @transform_5(%arg0: i32) -> (i32, i32, i32) {
    %c0_i32 = arith.constant 0 : i32
    %c0_i32_0 = arith.constant 0 : i32
    %c0_i32_1 = arith.constant 0 : i32
    return %arg0, %c0_i32, %c0_i32_0 : i32, i32, i32
  }
}

</mosaic_0001>

<bundles_post_ra>
// kernel: tpu_custom_call.1
= control target key start
LH: loop header
LB: loop body
LE: loop exit
PB: predicated region body
PF: predicated region fallthrough
CT: control target
= control target key end

     0   :  { %10 = vsyncpa [#allocation3], 0  ;;  %s1023_s0 = inlined_call_operand.hbm [shape: f32[2,32,256], index: 0, kind: input, shape index: {}]   ;;  %s1024_s1 = inlined_call_operand.vmem [shape: f32[32,2], index: 1, kind: input, shape index: {}]   ;;  %s1025_s2 = inlined_call_operand.vmem [shape: f32[1,2], index: 2, kind: input, shape index: {}]   ;;  %s1026_s3 = inlined_call_operand.vmem [shape: f32[2,32], index: 3, kind: input, shape index: {}]   ;;  %s1027_s4 = inlined_call_operand.vmem [shape: f32[1,32], index: 4, kind: input, shape index: {}]   ;;  %s1028_s5 = inlined_call_operand.hbm [shape: f32[2,32,256], index: 5, kind: output, shape index: {}]  }
   0x1   :  { %12 = vsyncpa [#allocation3 + $0x1], 0 }
   0x2   :  { %13 = vsyncpa [#allocation4], 0 }
   0x3   :  { %15 = vsyncpa [#allocation4 + $0x1], 0  ;;  %s812_s18 = smov 0   ;;  %s814_s19 = smov 0  }
   0x4   :  { %s816_s20 = smov 0   ;;  %s818_s21 = smov 0  }
   0x5 LB: > { %s833_s22 = sadd.s32 4294967295, %s772_s21   ;;  %s581_s23 = sadd.s32 4294967294, %s772_s21   ;;  %s772_s21 = sphi %s818_s21, %s1043_s21   ;;  %s768_s20 = sphi %s816_s20, %s1042_s20   ;;  %s764_s19 = sphi %s814_s19, %s1041_s19   ;;  %s760_s18 = sphi %s812_s18, %s1040_s18  }
   0x6   : > { %s837_s24 = sadd.s32 1, %s772_s21   ;;  %s28_s25 = sadd.s32 1, %s768_s20 }
   0x7   : > { %s25_s26 = ssub.s32 %s772_s21, %s837_s24  ;;  %p35_p0 = scmp.ne.s32.totalorder %s768_s20, %s764_s19 }
   0x8   : > { %p26_p1 = scmp.eq.s32.totalorder %s25_s26, 0  ;;  %p36_p2 = scmp.eq.s32.totalorder %s772_s21, 0 }
   0x9   : > { %p41_p3 = scmp.ne.s32.totalorder %s764_s19, %s760_s18  ;;  %p42_p4 = scmp.eq.s32.totalorder %s833_s22, 0 }
   0xa   : > { %s849_s27 = scalar_select %p26_p1, %s768_s20, %s28_s25  }
   0xb   : > { %p851_p5 = por %p36_p2, %p35_p0  ;;  %p855_p6 = por %p42_p4, %p41_p3 }
   0xc   : > { %p149_p7 = scmp.eq.s32.totalorder %s833_s22, 1  ;;  %p155_p8 = scmp.eq.s32.totalorder %s581_s23, 1 }
   0xd   : > { %s1032_s29 = scalar_select %p855_p6, 1, 0 }
   0xe   : > { %p636_p10 = scmp.lt.s32.totalorder %s772_s21, 2  ;;  %p862_p11 = por %p149_p7, %p35_p0 }
   0xf   : > { %p866_p12 = por %p155_p8, %p41_p3  ;;  %s187_s7 = sand.u32 1, %s768_s20  }
  0x10   : > { %s1033_s30 = scalar_select %p862_p11, 1, 0 }
  0x11   : > { %s1034_s6 = scalar_select %p866_p12, 1, 0 }
  0x12   : > { %s599_s8 = sshll.u32 %s772_s21, 10  ;;  %s584_s9 = sshll.u32 %s187_s7, 6 }
  0x13   : > { %s875_s12 = scalar_lea.hbm %s1023_s0, %s599_s8  ;;  %s191_s13 = scalar_lea.vmem [#allocation2], %s584_s9 }
  0x14   : > { %s198_s14 = sshll.u32 %s191_s13, 4  ;;  %p879_p13 = pnand %p636_p10, %p851_p5  ;;  %s883_s14 = int_to_ptr.vmem [resolvable:$true] %s198_s14 }
  0x15   : > { %s885_s16 = scalar_lea.sflag [#allocation3], %s187_s7  ;;  %s680_s17 = scalar_lea.hbm %s875_s12, 1024 }
  0x16   : > { %p681_p0 = scmp.ne.s32.totalorder %s875_s12, %s680_s17  ;;  %p682_p1 = pneg %p879_p13 }
  0x17   : > { %s685_s26 = scalar_lea.hbm %s1023_s0, 2048  ;;  %p686_p4 = scmp.lt.s32.totalorder %s875_s12, %s1023_s0 }
  0x18   : > { %p683_p2 = pnand %p682_p1, %p681_p0  ;;  %p687_p5 = scmp.lt.s32.totalorder %s685_s26, %s680_s17 }
  0x1a   : > { %p684_p3 = pneg %p683_p2  ;;  %p688_p7 = por %p687_p5, %p686_p4 }
  0x1c   : > { %p689_p8 = pnand %p688_p7, %p684_p3 }
  0x1e   : > { %692 = shalt.err (!%p689_p8)
}
  0x1f   : > { %s693_s7 = scalar_lea.vmem %s883_s14, 1024  ;;  %s774_s9 = smov [#allocation2]  }
  0x20   : > { %p694_p10 = scmp.ne.s32.totalorder %s883_s14, %s693_s7  ;;  %s698_s10 = sshll.u32 %s774_s9, 4  ;;  %s699_s10 = int_to_ptr.vmem [resolvable:$false] %s698_s10 }
  0x21   : > { %s700_s11 = scalar_lea.vmem %s699_s10, 2048  ;;  %p701_p2 = scmp.lt.s32.totalorder %s883_s14, %s699_s10 }
  0x22   : > { %p696_p9 = pnand %p694_p10, %p682_p1  ;;  %p702_p12 = scmp.lt.s32.totalorder %s700_s11, %s693_s7 }
  0x24   : > { %p697_p0 = pneg %p696_p9  ;;  %p703_p11 = por %p702_p12, %p701_p2 }
  0x26   : > { %p704_p6 = pnand %p703_p11, %p697_p0 }
  0x28   : > { %707 = shalt.err (!%p704_p6)
}
  0x29   : > { %s775_s13 = smov 256   ;;  %s776_s17 = smov 16  }
  0x2a   : > { %631 = dma.hbm_to_vmem [thread:$0]  (!%p879_p13), %s875_s12, 1024, %s883_s14, %s885_s16, %s775_s13, %s775_s13, %s776_s17  }
  0x2b   : > { %p587_p9 = scmp.ge.s32.totalorder %s772_s21, 1  ;;  %p206_p1 = scmp.lt.s32.totalorder %s772_s21, 3 }
  0x2d   : > { %p207_p3 = pnand %p587_p9, %p206_p1 }
  0x2e   : > { %s909_s23 = sand.u32 (!%p207_p3), 1, %s764_s19   ;;  %p1036_p6 = scmp.ne.s32.totalorder (!%p207_p3), %s1032_s29, 0 }
  0x2f   : > { %210 = sbr.rel (%p207_p3) target bundleno = 768 (0x300), region = 40  ;;  %s588_s25 = sshll.u32 (!%p207_p3), %s909_s23, 6 }
  0x30   : > { %s213_s26 = scalar_lea.sflag (!%p207_p3), [#allocation3], %s909_s23  ;;  %s216_s28 = scalar_lea.vmem (!%p207_p3), [#allocation2], %s588_s25 }
  0x34   : > { %751 = dma.done.wait (%p1036_p6), %s213_s26, 1024  }
  0x35   : > { %753 = vsyncadd (%p1036_p6), %s213_s26, 4294966272  ;;  %v919_v0 = vld [vmem:[%s216_s28] sm:$0xff]  ;;  %v921_v1 = vld [vmem:[%s216_s28 + $0x8] sm:$0xff]  ;;  %v777_v12 = vmov 0.0   ;;  %vm778_vm0 = vmmov 0   ;;  %v272_v17 = vlaneseq  ;;  %vm283_vm1 = vcmask 130112  }
  0x36   : > { %v923_v2 = vld [vmem:[%s216_s28 + $0x20] sm:$0xff]  ;;  %v251_v3 = vadd.f32 %v921_v1, %v919_v0  ;;  %v927_v4 = vld [vmem:[%s216_s28 + $0x28] sm:$0xff]  ;;  %v929_v5 = vld [vmem:[%s216_s28 + $0x10] sm:$0xff]  ;;  %608 = vmatprep.subr.mxu0 %v777_v12  ;;  %619 = vmatprep.subr.mxu1 %v777_v12  ;;  %vm290_vm2 = vcmask 195712   ;;  %vm297_vm3 = vcmask 261312   ;;  %vm299_vm4 = vcmask 261120  }
  0x37   : > { %v931_v6 = vld [vmem:[%s216_s28 + $0x18] sm:$0xff]  ;;  %v257_v7 = vadd.f32 %v927_v4, %v923_v2  ;;  %v935_v8 = vld [vmem:[%s216_s28 + $0x30] sm:$0xff]  ;;  %v264_v15 = vld [vmem:[%s1024_s1 + $0x8] sm:$0xff]  ;;  %616 = vmatprep.mubr.msk.f32.mxu0 %vm778_vm0, %v777_v12  ;;  %621 = vmatprep.mubr.msk.f32.mxu1 %vm778_vm0, %v777_v12  ;;  %v273_v18 = vand.u32 127, %v272_v17  ;;  %v275_v19 = vshrl.u32 %v272_v17, 7  ;;  %vm379_vm5 = vcmask 1041408  }
  0x38   : > { %v937_v9 = vld [vmem:[%s216_s28 + $0x38] sm:$0xff]  ;;  %252 = vadd.xlane.f32.xlu0 %v251_v3  ;;  %v254_v10 = vadd.f32 %v931_v6, %v929_v5  ;;  %v265_v14 = vld [vmem:[%s1024_s1 + $0x10] sm:$0xff]  ;;  %v263_v16 = vld [vmem:[%s1024_s1] sm:$0xff]  ;;  %vm375_vm6 = vcmask 15360   ;;  %s242_s29 = scalar_lea.vmem [#allocation5], %s588_s25  ;;  %s600_s14 = sshll.u32 %s833_s22, 10 }
  0x39   : > { %258 = vadd.xlane.f32.xlu1 %v257_v7  ;;  %v260_v11 = vadd.f32 %v937_v9, %v935_v8  ;;  %v266_v13 = vld [vmem:[%s1024_s1 + $0x18] sm:$0xff]  ;;  %v278_v20 = vadd.s32 4294967288, %v273_v18  ;;  %v285_v21 = vadd.s32 4294967280, %v273_v18  ;;  %v292_v22 = vadd.s32 4294967272, %v273_v18  ;;  %v373_v38 = vld [vmem:[%s1026_s3] sm:$0x3]  ;;  %s978_s16 = scalar_lea.hbm %s1028_s5, %s600_s14 }
  0x3a   : > { %609 = vmatpush3.msra.mxu0 %v266_v13  ;;  %v276_v24 = vsub.s32 %v273_v18, %v275_v19  ;;  %620 = vmatpush3.msk.msra.mxu1 %vm379_vm5, %v373_v38  ;;  %v267_v39 = vld [vmem:[%s1025_s2] sm:$0x1]  ;;  %v461_v51 = vsub.s32 0, %v275_v19  ;;  %s508_s12 = sshll.u32 %s242_s29, 4  ;;  %s495_s22 = scalar_lea.sflag [#allocation4], %s909_s23  ;;  %s973_s12 = int_to_ptr.vmem [resolvable:$true] %s508_s12 }
  0x3b   : > { %610 = vmatprep.subr.mxu0 %v777_v12  ;;  %v281_v26 = vsub.s32 %v278_v20, %v275_v19  ;;  %v288_v27 = vsub.s32 %v285_v21, %v275_v19  ;;  %v295_v28 = vsub.s32 %v292_v22, %v275_v19  ;;  %v374_v44 = vld [vmem:[%s1027_s4] sm:$0x1]  ;;  %s708_s8 = scalar_lea.vmem %s973_s12, 1024  ;;  %p1037_p12 = scmp.ne.s32.totalorder %s1033_s30, 0 }
  0x3c   : > { %255 = vadd.xlane.f32.xlu0 %v254_v10  ;;  %611 = vmatpush3.msra.mxu0 %v265_v14  ;;  %p709_p11 = scmp.ne.s32.totalorder %s973_s12, %s708_s8  ;;  %s779_s7 = smov [#allocation5]  }
  0x3d   : > { %261 = vadd.xlane.f32.xlu1 %v260_v11  ;;  %612 = vmatprep.subr.mxu0 %v777_v12  ;;  %s712_s9 = sshll.u32 %s779_s7, 4  ;;  %s713_s9 = int_to_ptr.vmem [resolvable:$false] %s712_s9 }
  0x3e   : > { %613 = vmatpush3.msra.mxu0 %v264_v15  ;;  %p710_p13 = pnand %p709_p11, %p1037_p12  ;;  %s714_s10 = scalar_lea.vmem %s713_s9, 2048 }
  0x3f   : > { %614 = vmatprep.subr.mxu0 %v777_v12  ;;  %p715_p5 = scmp.lt.s32.totalorder %s973_s12, %s713_s9  ;;  %p716_p7 = scmp.lt.s32.totalorder %s714_s10, %s708_s8 }
  0x40   : > { %615 = vmatpush3.msra.mxu0 %v263_v16  ;;  %p711_p4 = pneg %p710_p13 }
  0x41   : > { %p717_p8 = por %p716_p7, %p715_p5 }
  0x43   : > { %p718_p10 = pnand %p717_p8, %p711_p4 }
  0xc1   : > { %v253_v23 = vpop.xlane.xlu0 %252 }
  0xc2   : > { %v259_v25 = vpop.xlane.xlu1 %258  ;;  %v277_v30 = vrot.slane %v253_v23, %v276_v24 }
  0xc3   : > { %v289_v33 = vrot.slane %v259_v25, %v288_v27 }
  0xc5   : > { %v256_v29 = vpop.xlane.xlu0 %255 }
  0xc6   : > { %v282_v31 = vrot.slane %v256_v29, %v281_v26  ;;  %v262_v32 = vpop.xlane.xlu1 %261 }
  0xc7   : > { %v296_v34 = vrot.slane %v262_v32, %v295_v28 }
  0xc8   : > { %v284_v35 = vsel %vm283_vm1, %v282_v31, %v277_v30 }
  0xc9   : > { %v291_v36 = vsel %vm290_vm2, %v289_v33, %v284_v35 }
  0xca   : > { %v298_v37 = vsel %vm297_vm3, %v296_v34, %v291_v36 }
  0xcb   : > { %617 = vmatmul.mubr.msk.f32.vlgmr.msra.gmra.mxu0 %vm299_vm4, %v298_v37 }
 0x18b   : > { %v368_v40 = vpop.f32.mrf.mxu0 }
 0x18c   : > { %v369_v41 = vadd.f32 %v368_v40, %v267_v39 }
 0x18d   : > { %v618_v42 = vpop.f32.mrf.mxu0 }
 0x18e   : > { %v372_v43 = vmax.f32 %v369_v41, 0.0 }
 0x190   : > { %622 = vmatmul.mubr.msk.f32.vlgmr.msra.gmra.mxu1 %vm375_vm6, %v372_v43 }
 0x250   : > { %v449_v45 = vpop.f32.mrf.mxu1 }
 0x251   : > { %v450_v46 = vadd.f32 %v449_v45, %v374_v44 }
 0x252   : > { %v623_v47 = vpop.f32.mrf.mxu1 }
 0x253   : > { %v593_v48 = vmul.f32 -1.442695, %v450_v46 }
 0x255   : > { %676 = vpow2.f32 %v593_v48 }
 0x262   : > { %v677_v49 = vpop.eup %676 }
 0x263   : > { %v456_v50 = vadd.f32 1.0, %v677_v49 }
 0x265   : > { %678 = vrcp.f32 %v456_v50 }
 0x272   : > { %v679_v52 = vpop.eup %678 }
 0x273   : > { %v462_v53 = vrot.slane %v679_v52, %v461_v51 }
 0x275   : > { %468 = vbcast.lane.b32.xlu1 %v462_v53, 264  ;;  %464 = vbcast.lane.b32.xlu0 %v462_v53, 256 }
 0x279   : > { %472 = vbcast.lane.b32.xlu1 %v462_v53, 272 }
 0x27d   : > { %476 = vbcast.lane.b32.xlu1 %v462_v53, 280 }
 0x2e7   : > { %v469_v54 = vpop.permute.xlu1 %468  ;;  %v465_v55 = vpop.permute.xlu0 %464 }
 0x2e8   : > { %v480_v56 = vmul.f32 %v469_v54, %v929_v5  ;;  %v481_v57 = vmul.f32 %v469_v54, %v931_v6  ;;  %v478_v58 = vmul.f32 %v465_v55, %v919_v0  ;;  %v479_v59 = vmul.f32 %v465_v55, %v921_v1 }
 0x2ea   : > { %488 = vst [vmem:[%s242_s29 + $0x10] sm:$0xff] %v480_v56  ;;  %489 = vst [vmem:[%s242_s29 + $0x18] sm:$0xff] %v481_v57 }
 0x2eb   : > { %486 = vst [vmem:[%s242_s29] sm:$0xff] %v478_v58  ;;  %487 = vst [vmem:[%s242_s29 + $0x8] sm:$0xff] %v479_v59  ;;  %v473_v60 = vpop.permute.xlu1 %472 }
 0x2ec   : > { %v482_v61 = vmul.f32 %v473_v60, %v923_v2  ;;  %v483_v62 = vmul.f32 %v473_v60, %v927_v4 }
 0x2ee   : > { %490 = vst [vmem:[%s242_s29 + $0x20] sm:$0xff] %v482_v61  ;;  %491 = vst [vmem:[%s242_s29 + $0x28] sm:$0xff] %v483_v62 }
 0x2ef   : > { %v477_v63 = vpop.permute.xlu1 %476 }
 0x2f0   : > { %v484_v0 = vmul.f32 %v477_v63, %v935_v8  ;;  %v485_v1 = vmul.f32 %v477_v63, %v937_v9 }
 0x2f2   : > { %492 = vst [vmem:[%s242_s29 + $0x30] sm:$0xff] %v484_v0  ;;  %493 = vst [vmem:[%s242_s29 + $0x38] sm:$0xff] %v485_v1 }
 0x2f3   : > { %721 = shalt.err (!%p718_p10)
}
 0x2f4   : > { %s722_s11 = scalar_lea.hbm %s978_s16, 1024  ;;  %s726_s26 = scalar_lea.hbm %s1028_s5, 2048 }
 0x2f5   : > { %p723_p0 = scmp.ne.s32.totalorder %s978_s16, %s722_s11  ;;  %p727_p1 = scmp.lt.s32.totalorder %s978_s16, %s1028_s5 }
 0x2f6   : > { %p728_p3 = scmp.lt.s32.totalorder %s726_s26, %s722_s11 }
 0x2f7   : > { %p724_p2 = pnand %p723_p0, %p1037_p12 }
 0x2f8   : > { %p729_p6 = por %p728_p3, %p727_p1 }
 0x2f9   : > { %p725_p9 = pneg %p724_p2 }
 0x2fb   : > { %p730_p11 = pnand %p729_p6, %p725_p9 }
 0x2fd   : > { %733 = shalt.err (!%p730_p11)
}
 0x2fe   : > { %s780_s14 = smov 256   ;;  %s781_s25 = smov 16  }
 0x2ff   : > { %626 = dma.vmem_to_hbm [thread:$0]  (%p1037_p12), %s973_s12, 1024, %s978_s16, %s495_s22, %s780_s14, %s780_s14, %s781_s25  }
 0x300 PF: > { %s523_s15 = sand.u32 1, %s760_s18   ;;  %p1038_p13 = scmp.ne.s32.totalorder %s1034_s6, 0 }
 0x301   : > { %p1039_p4 = scmp.ge.s32.totalorder %s772_s21, 2  ;;  %s524_s8 = scalar_lea.sflag [#allocation4], %s523_s15 }
 0x303   : > { %p633_p5 = pnand %p1039_p4, %p1038_p13 }
 0x305   : > { %p634_p7 = pneg %p633_p5 }
 0x307   : > { %755 = dma.done.wait (%p634_p7), %s524_s8, 1024  }
 0x308   : > { %757 = vsyncadd (%p634_p7), %s524_s8, 4294966272  ;;  %p18_p8 = scmp.ge.s32.totalorder %s837_s24, 4   ;;  %s1040_s18 = smov %s764_s19 }
 0x309   : > { %s1041_s19 = smov %s768_s20  ;;  %s1042_s20 = smov %s849_s27 }
 0x30a   : > { %s1043_s21 = smov %s837_s24  ;;  %20 = sbr.rel (!%p18_p8) target bundleno = 5 (0x5), region = 85 }
 0x30f   :  { %529 = vsyncpa [#allocation3], 1 }
 0x310   :  { %531 = vsyncpa [#allocation3 + $0x1], 1 }
 0x311   :  { %532 = vsyncpa [#allocation4], 1 }
 0x312   :  { %534 = vsyncpa [#allocation4 + $0x1], 1 }

</bundles_post_ra>
